<compile_context>
chip_gen: v7x
topology: tpu7x:2x2x1
jax: 0.10.0
libtpu: 0.0.40
codegen_flags: <defaults>
</compile_context>

<pallas_src>
import functools

import jax
import jax.numpy as jnp
from jax.experimental import pallas as pl
from jax.experimental.pallas import tpu as pltpu

N_EMBD = 32
BLOCK_SIZE = 8
N_HEAD = 4
HEAD_SIZE = N_EMBD // N_HEAD


def _block_kernel(x_ref, wqkv_ref, wp_ref, bp_ref,
                  w1_ref, b1_ref, w2_ref, b2_ref, bias_ref, o_ref,
                  *, n_head, head_size):
    x = x_ref[...]                               # (BT, C) float32
    C = n_head * head_size

    # --- fused q/k/v projection: one (BT, C) @ (C, 3C) matmul -----------------
    qkv = jnp.dot(x, wqkv_ref[...], preferred_element_type=jnp.float32)  # (BT, 3C)
    q = qkv[:, 0 * C:1 * C]                      # (BT, C)  (scale already folded in)
    k = qkv[:, 1 * C:2 * C]
    v = qkv[:, 2 * C:3 * C]

    # --- batched multi-head attention (single pass over all heads) -----------
    # Stack heads on a leading (batch) axis: (H, BT, hs).
    qh = jnp.stack([q[:, h * head_size:(h + 1) * head_size] for h in range(n_head)], axis=0)
    kh = jnp.stack([k[:, h * head_size:(h + 1) * head_size] for h in range(n_head)], axis=0)
    vh = jnp.stack([v[:, h * head_size:(h + 1) * head_size] for h in range(n_head)], axis=0)

    # Scores over the flattened (B*T) key axis; the precomputed additive bias
    # (0 / -1e30) encodes both the causal mask and the same-batch constraint.
    wei = jnp.einsum('htd,hsd->hts', qh, kh,
                     preferred_element_type=jnp.float32)          # (H, BT, BT)
    wei = wei + bias_ref[...][None, :, :]

    # Single softmax over the key axis (all heads at once).
    m = jnp.max(wei, axis=-1, keepdims=True)
    e = jnp.exp(wei - m)
    denom = jnp.sum(e, axis=-1, keepdims=True)
    p = e * pl.reciprocal(denom, approx=True)

    oh = jnp.einsum('hts,hsd->htd', p, vh,
                    preferred_element_type=jnp.float32)           # (H, BT, hs)
    sa = jnp.concatenate([oh[h] for h in range(n_head)], axis=-1)  # (BT, C)

    # Attention output projection + residual 1.
    sa = jnp.dot(sa, wp_ref[...], preferred_element_type=jnp.float32) + bp_ref[...]
    x1 = x + sa

    # --- feed-forward (2-D matmuls) + residual 2 ------------------------------
    h1 = jnp.dot(x1, w1_ref[...], preferred_element_type=jnp.float32) + b1_ref[...]
    h1 = jnp.maximum(h1, 0.0)                                      # ReLU
    ff = jnp.dot(h1, w2_ref[...], preferred_element_type=jnp.float32) + b2_ref[...]

    o_ref[...] = (x1 + ff).astype(o_ref.dtype)


def block_forward(x, prepped):
    """x: (B, T, C) float32.  prepped: output of prepare_params()."""
    B, T, C = x.shape
    x2d = x.reshape(B * T, C)
    args = (x2d, prepped['wqkv'], prepped['wp'], prepped['bp'],
            prepped['w1'], prepped['b1'], prepped['w2'], prepped['b2'],
            prepped['attn_bias'])
    vmem = pl.BlockSpec(memory_space=pltpu.MemorySpace.VMEM)
    out2d = pl.pallas_call(
        functools.partial(_block_kernel, n_head=N_HEAD, head_size=HEAD_SIZE),
        out_shape=jax.ShapeDtypeStruct((B * T, C), jnp.float32),
        in_specs=[vmem] * len(args),
        out_specs=vmem,
        cost_estimate=pl.CostEstimate(flops=430_000,
                                      transcendentals=1_100,
                                      bytes_accessed=56_000),
    )(*args)
    return out2d.reshape(B, T, C)


def init_params(key):
    """Deterministic parameter init matching the torch module's shapes
    (weights stored transposed, i.e. in `x @ W` orientation)."""
    ks = jax.random.split(key, 8)
    s = 0.02
    return {
        # per-head key/query/value weights, concatenated along the output axis
        'wq': s * jax.random.normal(ks[0], (N_EMBD, N_EMBD), jnp.float32),
        'wk': s * jax.random.normal(ks[1], (N_EMBD, N_EMBD), jnp.float32),
        'wv': s * jax.random.normal(ks[2], (N_EMBD, N_EMBD), jnp.float32),
        # MultiHeadAttention.proj : Linear(C, C)
        'wp': s * jax.random.normal(ks[3], (N_EMBD, N_EMBD), jnp.float32),
        'bp': s * jax.random.normal(ks[4], (1, N_EMBD), jnp.float32),
        # FeedForward: Linear(C, 4C) -> ReLU -> Linear(4C, C)
        'w1': s * jax.random.normal(ks[5], (N_EMBD, 4 * N_EMBD), jnp.float32),
        'b1': s * jax.random.normal(ks[6], (1, 4 * N_EMBD), jnp.float32),
        'w2': s * jax.random.normal(ks[7], (4 * N_EMBD, N_EMBD), jnp.float32),
        'b2': jnp.zeros((1, N_EMBD), jnp.float32),
    }


def prepare_params(params, batch, seq):
    """One-time kernel-friendly parameter prep:
       - fuse wq/wk/wv into one (C, 3C) weight with the attention scale folded
         into the q columns;
       - precompute the additive attention bias (causal + same-batch) over the
         flattened (B*T) row axis."""
    scale = jnp.float32(HEAD_SIZE) ** -0.5
    wqkv = jnp.concatenate([params['wq'] * scale, params['wk'], params['wv']],
                           axis=1)                                  # (C, 3C)

    row_b = jnp.repeat(jnp.arange(batch), seq)                      # (B*T,)
    row_t = jnp.tile(jnp.arange(seq), batch)                        # (B*T,)
    allow = (row_b[:, None] == row_b[None, :]) & (row_t[None, :] <= row_t[:, None])
    attn_bias = jnp.where(allow, 0.0, -1e30).astype(jnp.float32)    # (B*T, B*T)

    return {
        'wqkv': wqkv,
        'wp': params['wp'], 'bp': params['bp'],
        'w1': params['w1'], 'b1': params['b1'],
        'w2': params['w2'], 'b2': params['b2'],
        'attn_bias': attn_bias,
    }


def block_reference(x, p):
    """Pure-JAX reference mirroring the torch forward pass (unfused params)."""
    B, T, C = x.shape
    q = x @ p['wq']
    k = x @ p['wk']
    v = x @ p['wv']
    tril = jnp.tril(jnp.ones((T, T), jnp.float32))
    outs = []
    for h in range(N_HEAD):
        sl = slice(h * HEAD_SIZE, (h + 1) * HEAD_SIZE)
        wei = jnp.einsum('btd,bsd->bts', q[:, :, sl], k[:, :, sl]) * HEAD_SIZE ** -0.5
        wei = jnp.where(tril[None] == 0, -jnp.inf, wei)
        wei = jax.nn.softmax(wei, axis=-1)
        outs.append(jnp.einsum('bts,bsd->btd', wei, v[:, :, sl]))
    sa = jnp.concatenate(outs, axis=-1) @ p['wp'] + p['bp']
    x1 = x + sa
    ff = jnp.maximum(x1 @ p['w1'] + p['b1'], 0.0) @ p['w2'] + p['b2']
    return x1 + ff


if __name__ == "__main__":
    key = jax.random.PRNGKey(0)
    kx, kp = jax.random.split(key)
    B, T, C = 2, BLOCK_SIZE, N_EMBD
    x = jax.random.normal(kx, (B, T, C), jnp.float32)
    params = init_params(kp)
    prepped = prepare_params(params, B, T)

    out = block_forward(x, prepped)
    out = jax.block_until_ready(out)

    ref = block_reference(x, params)
    assert out.shape == (B, T, C)
    assert jnp.allclose(out, ref, atol=2e-3, rtol=2e-3), "mismatch vs reference"
    print("KERNEL_OK")
</pallas_src>

<mosaic_0001>
module attributes {stable_mosaic.version = 11 : i64} {
  func.func @_block_kernel(%arg0: memref<16x32xf32, #tpu.memory_space<vmem>>, %arg1: memref<32x96xf32, #tpu.memory_space<vmem>>, %arg2: memref<32x32xf32, #tpu.memory_space<vmem>>, %arg3: memref<1x32xf32, #tpu.memory_space<vmem>>, %arg4: memref<32x128xf32, #tpu.memory_space<vmem>>, %arg5: memref<1x128xf32, #tpu.memory_space<vmem>>, %arg6: memref<128x32xf32, #tpu.memory_space<vmem>>, %arg7: memref<1x32xf32, #tpu.memory_space<vmem>>, %arg8: memref<16x16xf32, #tpu.memory_space<vmem>>, %arg9: memref<16x32xf32, #tpu.memory_space<vmem>>) attributes {dimension_semantics = [], scalar_prefetch = 0 : i64, scratch_operands = 0 : i64, tpu.core_type = #tpu.core_type<tc>} {
    %c0 = arith.constant 0 : index
    %c0_0 = arith.constant 0 : index
    %0 = vector.load %arg0[%c0, %c0_0] : memref<16x32xf32, #tpu.memory_space<vmem>>, vector<16x32xf32>
    %c0_1 = arith.constant 0 : index
    %c0_2 = arith.constant 0 : index
    %1 = vector.load %arg1[%c0_1, %c0_2] : memref<32x96xf32, #tpu.memory_space<vmem>>, vector<32x96xf32>
    %cst = arith.constant dense<0.000000e+00> : vector<16x96xf32>
    %2 = tpu.matmul %0, %1, %cst {dimension_numbers = #tpu.dot_dimension_numbers<[1], [0], [0], [1], [0, 0, 1, 1], [], []>} : vector<16x32xf32>, vector<32x96xf32>, vector<16x96xf32> -> vector<16x96xf32>
    %3 = vector.extract_strided_slice %2 {offsets = [0, 0], sizes = [16, 32], strides = [1, 1]} : vector<16x96xf32> to vector<16x32xf32>
    %4 = vector.extract_strided_slice %2 {offsets = [0, 32], sizes = [16, 32], strides = [1, 1]} : vector<16x96xf32> to vector<16x32xf32>
    %5 = vector.extract_strided_slice %2 {offsets = [0, 64], sizes = [16, 32], strides = [1, 1]} : vector<16x96xf32> to vector<16x32xf32>
    %6 = vector.extract_strided_slice %3 {offsets = [0, 0], sizes = [16, 8], strides = [1, 1]} : vector<16x32xf32> to vector<16x8xf32>
    %7 = vector.extract_strided_slice %3 {offsets = [0, 8], sizes = [16, 8], strides = [1, 1]} : vector<16x32xf32> to vector<16x8xf32>
    %8 = vector.extract_strided_slice %3 {offsets = [0, 16], sizes = [16, 8], strides = [1, 1]} : vector<16x32xf32> to vector<16x8xf32>
    %9 = vector.extract_strided_slice %3 {offsets = [0, 24], sizes = [16, 8], strides = [1, 1]} : vector<16x32xf32> to vector<16x8xf32>
    %10 = vector.shape_cast %6 : vector<16x8xf32> to vector<1x16x8xf32>
    %11 = vector.shape_cast %7 : vector<16x8xf32> to vector<1x16x8xf32>
    %12 = vector.shape_cast %8 : vector<16x8xf32> to vector<1x16x8xf32>
    %13 = vector.shape_cast %9 : vector<16x8xf32> to vector<1x16x8xf32>
    %14 = tpu.concatenate %10, %11, %12, %13 in 0 : vector<1x16x8xf32>, vector<1x16x8xf32>, vector<1x16x8xf32>, vector<1x16x8xf32> -> vector<4x16x8xf32>
    %15 = vector.extract_strided_slice %4 {offsets = [0, 0], sizes = [16, 8], strides = [1, 1]} : vector<16x32xf32> to vector<16x8xf32>
    %16 = vector.extract_strided_slice %4 {offsets = [0, 8], sizes = [16, 8], strides = [1, 1]} : vector<16x32xf32> to vector<16x8xf32>
    %17 = vector.extract_strided_slice %4 {offsets = [0, 16], sizes = [16, 8], strides = [1, 1]} : vector<16x32xf32> to vector<16x8xf32>
    %18 = vector.extract_strided_slice %4 {offsets = [0, 24], sizes = [16, 8], strides = [1, 1]} : vector<16x32xf32> to vector<16x8xf32>
    %19 = vector.shape_cast %15 : vector<16x8xf32> to vector<1x16x8xf32>
    %20 = vector.shape_cast %16 : vector<16x8xf32> to vector<1x16x8xf32>
    %21 = vector.shape_cast %17 : vector<16x8xf32> to vector<1x16x8xf32>
    %22 = vector.shape_cast %18 : vector<16x8xf32> to vector<1x16x8xf32>
    %23 = tpu.concatenate %19, %20, %21, %22 in 0 : vector<1x16x8xf32>, vector<1x16x8xf32>, vector<1x16x8xf32>, vector<1x16x8xf32> -> vector<4x16x8xf32>
    %24 = vector.extract_strided_slice %5 {offsets = [0, 0], sizes = [16, 8], strides = [1, 1]} : vector<16x32xf32> to vector<16x8xf32>
    %25 = vector.extract_strided_slice %5 {offsets = [0, 8], sizes = [16, 8], strides = [1, 1]} : vector<16x32xf32> to vector<16x8xf32>
    %26 = vector.extract_strided_slice %5 {offsets = [0, 16], sizes = [16, 8], strides = [1, 1]} : vector<16x32xf32> to vector<16x8xf32>
    %27 = vector.extract_strided_slice %5 {offsets = [0, 24], sizes = [16, 8], strides = [1, 1]} : vector<16x32xf32> to vector<16x8xf32>
    %28 = vector.shape_cast %24 : vector<16x8xf32> to vector<1x16x8xf32>
    %29 = vector.shape_cast %25 : vector<16x8xf32> to vector<1x16x8xf32>
    %30 = vector.shape_cast %26 : vector<16x8xf32> to vector<1x16x8xf32>
    %31 = vector.shape_cast %27 : vector<16x8xf32> to vector<1x16x8xf32>
    %32 = tpu.concatenate %28, %29, %30, %31 in 0 : vector<1x16x8xf32>, vector<1x16x8xf32>, vector<1x16x8xf32>, vector<1x16x8xf32> -> vector<4x16x8xf32>
    "tpu.trace_start"() <{level = 10 : i32, message = "htd,hsd->hts"}> : () -> ()
    %cst_3 = arith.constant dense<0.000000e+00> : vector<4x16x16xf32>
    %33 = tpu.matmul %14, %23, %cst_3 {dimension_numbers = #tpu.dot_dimension_numbers<[2], [2], [1], [1], [0, 0, 0, 1, 1, 1], [0], [0]>} : vector<4x16x8xf32>, vector<4x16x8xf32>, vector<4x16x16xf32> -> vector<4x16x16xf32>
    "tpu.trace_stop"() : () -> ()
    %c0_4 = arith.constant 0 : index
    %c0_5 = arith.constant 0 : index
    %34 = vector.load %arg8[%c0_4, %c0_5] : memref<16x16xf32, #tpu.memory_space<vmem>>, vector<16x16xf32>
    %35 = vector.shape_cast %34 : vector<16x16xf32> to vector<1x16x16xf32>
    %36 = vector.broadcast %35 : vector<1x16x16xf32> to vector<4x16x16xf32>
    %37 = arith.addf %33, %36 : vector<4x16x16xf32>
    %cst_6 = arith.constant dense<0xFF800000> : vector<4x16xf32>
    %38 = vector.multi_reduction <maximumf>, %37, %cst_6 [2] : vector<4x16x16xf32> to vector<4x16xf32>
    %39 = vector.shape_cast %38 : vector<4x16xf32> to vector<4x16x1xf32>
    %40 = vector.broadcast %39 : vector<4x16x1xf32> to vector<4x16x16xf32>
    %41 = arith.subf %37, %40 : vector<4x16x16xf32>
    %42 = math.exp %41 : vector<4x16x16xf32>
    %cst_7 = arith.constant dense<0.000000e+00> : vector<4x16xf32>
    %43 = vector.multi_reduction <add>, %42, %cst_7 [2] : vector<4x16x16xf32> to vector<4x16xf32>
    %44 = vector.shape_cast %43 : vector<4x16xf32> to vector<4x16x1xf32>
    %45 = tpu.reciprocal %44 {approx = true} : vector<4x16x1xf32> -> vector<4x16x1xf32>
    %46 = vector.broadcast %45 : vector<4x16x1xf32> to vector<4x16x16xf32>
    %47 = arith.mulf %42, %46 : vector<4x16x16xf32>
    "tpu.trace_start"() <{level = 10 : i32, message = "hts,hsd->htd"}> : () -> ()
    %cst_8 = arith.constant dense<0.000000e+00> : vector<4x16x8xf32>
    %48 = tpu.matmul %47, %32, %cst_8 {dimension_numbers = #tpu.dot_dimension_numbers<[2], [1], [1], [2], [0, 0, 0, 1, 1, 2], [0], [0]>} : vector<4x16x16xf32>, vector<4x16x8xf32>, vector<4x16x8xf32> -> vector<4x16x8xf32>
    "tpu.trace_stop"() : () -> ()
    %49 = vector.extract_strided_slice %48 {offsets = [0, 0, 0], sizes = [1, 16, 8], strides = [1, 1, 1]} : vector<4x16x8xf32> to vector<1x16x8xf32>
    %50 = vector.shape_cast %49 : vector<1x16x8xf32> to vector<16x8xf32>
    %51 = vector.extract_strided_slice %48 {offsets = [1, 0, 0], sizes = [1, 16, 8], strides = [1, 1, 1]} : vector<4x16x8xf32> to vector<1x16x8xf32>
    %52 = vector.shape_cast %51 : vector<1x16x8xf32> to vector<16x8xf32>
    %53 = vector.extract_strided_slice %48 {offsets = [2, 0, 0], sizes = [1, 16, 8], strides = [1, 1, 1]} : vector<4x16x8xf32> to vector<1x16x8xf32>
    %54 = vector.shape_cast %53 : vector<1x16x8xf32> to vector<16x8xf32>
    %55 = vector.extract_strided_slice %48 {offsets = [3, 0, 0], sizes = [1, 16, 8], strides = [1, 1, 1]} : vector<4x16x8xf32> to vector<1x16x8xf32>
    %56 = vector.shape_cast %55 : vector<1x16x8xf32> to vector<16x8xf32>
    %57 = tpu.concatenate %50, %52, %54, %56 in 1 : vector<16x8xf32>, vector<16x8xf32>, vector<16x8xf32>, vector<16x8xf32> -> vector<16x32xf32>
    %c0_9 = arith.constant 0 : index
    %c0_10 = arith.constant 0 : index
    %58 = vector.load %arg2[%c0_9, %c0_10] : memref<32x32xf32, #tpu.memory_space<vmem>>, vector<32x32xf32>
    %cst_11 = arith.constant dense<0.000000e+00> : vector<16x32xf32>
    %59 = tpu.matmul %57, %58, %cst_11 {dimension_numbers = #tpu.dot_dimension_numbers<[1], [0], [0], [1], [0, 0, 1, 1], [], []>} : vector<16x32xf32>, vector<32x32xf32>, vector<16x32xf32> -> vector<16x32xf32>
    %c0_12 = arith.constant 0 : index
    %c0_13 = arith.constant 0 : index
    %60 = vector.load %arg3[%c0_12, %c0_13] : memref<1x32xf32, #tpu.memory_space<vmem>>, vector<1x32xf32>
    %61 = vector.broadcast %60 : vector<1x32xf32> to vector<16x32xf32>
    %62 = arith.addf %59, %61 : vector<16x32xf32>
    %63 = arith.addf %0, %62 : vector<16x32xf32>
    %c0_14 = arith.constant 0 : index
    %c0_15 = arith.constant 0 : index
    %64 = vector.load %arg4[%c0_14, %c0_15] : memref<32x128xf32, #tpu.memory_space<vmem>>, vector<32x128xf32>
    %cst_16 = arith.constant dense<0.000000e+00> : vector<16x128xf32>
    %65 = tpu.matmul %63, %64, %cst_16 {dimension_numbers = #tpu.dot_dimension_numbers<[1], [0], [0], [1], [0, 0, 1, 1], [], []>} : vector<16x32xf32>, vector<32x128xf32>, vector<16x128xf32> -> vector<16x128xf32>
    %c0_17 = arith.constant 0 : index
    %c0_18 = arith.constant 0 : index
    %66 = vector.load %arg5[%c0_17, %c0_18] : memref<1x128xf32, #tpu.memory_space<vmem>>, vector<1x128xf32>
    %67 = vector.broadcast %66 : vector<1x128xf32> to vector<16x128xf32>
    %68 = arith.addf %65, %67 : vector<16x128xf32>
    %cst_19 = arith.constant 0.000000e+00 : f32
    %69 = vector.broadcast %cst_19 : f32 to vector<16x128xf32>
    %70 = arith.maximumf %68, %69 : vector<16x128xf32>
    %c0_20 = arith.constant 0 : index
    %c0_21 = arith.constant 0 : index
    %71 = vector.load %arg6[%c0_20, %c0_21] : memref<128x32xf32, #tpu.memory_space<vmem>>, vector<128x32xf32>
    %cst_22 = arith.constant dense<0.000000e+00> : vector<16x32xf32>
    %72 = tpu.matmul %70, %71, %cst_22 {dimension_numbers = #tpu.dot_dimension_numbers<[1], [0], [0], [1], [0, 0, 1, 1], [], []>} : vector<16x128xf32>, vector<128x32xf32>, vector<16x32xf32> -> vector<16x32xf32>
    %c0_23 = arith.constant 0 : index
    %c0_24 = arith.constant 0 : index
    %73 = vector.load %arg7[%c0_23, %c0_24] : memref<1x32xf32, #tpu.memory_space<vmem>>, vector<1x32xf32>
    %74 = vector.broadcast %73 : vector<1x32xf32> to vector<16x32xf32>
    %75 = arith.addf %72, %74 : vector<16x32xf32>
    %76 = arith.addf %63, %75 : vector<16x32xf32>
    %c0_25 = arith.constant 0 : index
    %c0_26 = arith.constant 0 : index
    %77 = vector.load %arg9[%c0_25, %c0_26] : memref<16x32xf32, #tpu.memory_space<vmem>>, vector<16x32xf32>
    tpu.vector_store %arg9[%c0_25, %c0_26], %76 {strides = array<i32>} : memref<16x32xf32, #tpu.memory_space<vmem>>, vector<16x32xf32>,
    return
  }
}

</mosaic_0001>

<bundles_post_ra>
// kernel: tpu_custom_call.1
= control target key start
LH: loop header
LB: loop body
LE: loop exit
PB: predicated region body
PF: predicated region fallthrough
CT: control target
= control target key end

     0   :  { %vm39_vm0 = vcmask 261120   ;;  %s1977_s0 = inlined_call_operand.vmem [shape: f32[16,32], index: 0, kind: input, shape index: {}]   ;;  %s1978_s1 = inlined_call_operand.vmem [shape: f32[32,96], index: 1, kind: input, shape index: {}]   ;;  %s1979_s2 = inlined_call_operand.vmem [shape: f32[32,32], index: 2, kind: input, shape index: {}]   ;;  %s1980_s3 = inlined_call_operand.vmem [shape: f32[1,32], index: 3, kind: input, shape index: {}]   ;;  %s1981_s4 = inlined_call_operand.vmem [shape: f32[32,128], index: 4, kind: input, shape index: {}]   ;;  %s1982_s5 = inlined_call_operand.vmem [shape: f32[1,128], index: 5, kind: input, shape index: {}]   ;;  %s1983_s6 = inlined_call_operand.vmem [shape: f32[128,32], index: 6, kind: input, shape index: {}]   ;;  %s1984_s7 = inlined_call_operand.vmem [shape: f32[1,32], index: 7, kind: input, shape index: {}]   ;;  %s1985_s8 = inlined_call_operand.vmem [shape: f32[16,16], index: 8, kind: input, shape index: {}]   ;;  %s1986_s9 = inlined_call_operand.hbm [shape: f32[16,32], index: 9, kind: output, shape index: {}]  }
   0x1   :  { %v35_v0 = vld [vmem:[%s1978_s1] sm:$0xff]  ;;  %v36_v1 = vld [vmem:[%s1978_s1 + $0x8] sm:$0xff]  ;;  %v37_v2 = vld [vmem:[%s1978_s1 + $0x10] sm:$0xff] }
   0x2   :  { %v1485_v3 = vpack.c.bf16 %v36_v1, %v35_v0  ;;  %v38_v4 = vld [vmem:[%s1978_s1 + $0x18] sm:$0xff]  ;;  %v1762_v5 = vld [vmem:[%s1977_s0] sm:$0xff] }
   0x3   :  { %v1489_v6 = vpack.c.bf16 %v38_v4, %v37_v2  ;;  %1369 = vmatprep.mubr.msk.f32.mxu1 %vm39_vm0, %v1762_v5 }
   0x4   :  { %14 = vsyncpa [#allocation3], 0  ;;  %1486 = vmatprep.subr.bf16.mxu1 %v1485_v3  ;;  %v1769_v7 = vld [vmem:[%s1977_s0 + $0x8] sm:$0xff]  ;;  %vm141_vm1 = vcmask 64512   ;;  %s1687_s1 = smov 112   ;;  %s1688_s21 = smov 120  }
   0x5   :  { %1488 = vmatpush3.bf16.msra.mxu1 %v1485_v3  ;;  %s1689_s22 = smov 104   ;;  %s1690_s0 = smov 96   ;;  %vm1789_vm2 = vmpackc.low %vm141_vm1, %vm141_vm1  ;;  %v136_v37 = vld [vmem:[%s1985_s8 + $0x8] sm:$0xff]  ;;  %v135_v38 = vld [vmem:[%s1985_s8] sm:$0xff]  ;;  %vm486_vm3 = vcmask 130048   ;;  %vm951_vm4 = vcmask 195584  }
   0x6   :  { %1490 = vmatprep.subr.bf16.mxu1 %v1489_v6  ;;  %s1691_s8 = smov 64   ;;  %s1692_s10 = smov 8  }
   0x7   :  { %s1693_s19 = smov 16  }
   0x9   :  { %1492 = vmatpush3.bf16.msra.mxu1 %v1489_v6 }
   0xc   :  { %1370 = vmatmul.mubr.msk.f32.vlgmr.msra.gmra.mrb[0].mxu1 %vm39_vm0, %v1769_v7 }
  0xdf   :  { %v1371_v8 = vpop.f32.mrb[0].mxu1 }
  0xe0   :  { %129 = vrot.lane.b32.xlu1 %v1371_v8, %s1687_s1  ;;  %v112_v9 = vpop.f32.mrb[1].mxu1 }
  0xe1   :  { %123 = vrot.lane.b32.xlu0 %v112_v9, %s1688_s21  ;;  %1376 = vmatprep.mubr.msk.f32.mxu1 %vm141_vm1, %v112_v9  ;;  %v1774_v10 = vpack.i.bf16 %v1371_v8, %v112_v9 }
  0xe4   :  { %127 = vrot.lane.b32.xlu1 %v112_v9, %s1687_s1 }
  0xe5   :  { %125 = vrot.lane.b32.xlu0 %v1371_v8, %s1688_s21 }
  0xe8   :  { %133 = vrot.lane.b32.xlu1 %v1371_v8, %s1689_s22 }
  0xe9   :  { %131 = vrot.lane.b32.xlu0 %v112_v9, %s1689_s22 }
  0xed   :  { %1592 = vrot.lane.b32.xlu0 %v1774_v10, %s1690_s0 }
 0x152   :  { %v130_v11 = vpop.permute.xlu1 %129 }
 0x153   :  { %v124_v12 = vpop.permute.xlu0 %123 }
 0x156   :  { %v128_v13 = vpop.permute.xlu1 %127 }
 0x157   :  { %v1777_v14 = vpack.i.bf16 %v130_v11, %v128_v13  ;;  %v126_v15 = vpop.permute.xlu0 %125 }
 0x158   :  { %v1779_v16 = vpack.i.bf16 %v126_v15, %v124_v12 }
 0x159   :  { %1602 = vrot.lane.b32.xlu0 %v1777_v14, %s1690_s0 }
 0x15a   :  { %v134_v17 = vpop.permute.xlu1 %133  ;;  %1597 = vrot.lane.b32.xlu1 %v1779_v16, %s1690_s0 }
 0x15b   :  { %v132_v18 = vpop.permute.xlu0 %131 }
 0x15c   :  { %v1783_v19 = vpack.i.bf16 %v134_v17, %v132_v18  ;;  %1397 = vmatprep.mubr.msk.f32.mxu0 %vm141_vm1, %v132_v18 }
 0x15e   :  { %1607 = vrot.lane.b32.xlu1 %v1783_v19, %s1690_s0 }
 0x15f   :  { %v1593_v20 = vpop.permute.xlu0 %1592 }
 0x160   :  { %v1595_v21 = vunpack.i.h.bf16 %v1593_v20  ;;  %v1594_v22 = vunpack.i.l.bf16 %v1593_v20 }
 0x162   :  { %v1493_v24 = vpack.c.bf16 %v1595_v21, %v1594_v22 }
 0x164   :  { %1495 = vmatprep.subr.msk.bf16.mxu1 %vm1789_vm2, %v1493_v24 }
 0x165   :  { %1498 = vmatpush3.bf16.xpose.msk.msra.mxu1 %vm1789_vm2, %v1493_v24 }
 0x16c   :  { %1377 = vmatmul.mubr.msk.f32.vlgmr.msra.gmra.mrb[2].mxu1 %vm141_vm1, %v1371_v8 }
 0x16d   :  { %1383 = vmatprep.mubr.msk.f32.mxu1 %vm141_vm1, %v124_v12 }
 0x1cb   :  { %v1603_v25 = vpop.permute.xlu0 %1602 }
 0x1cc   :  { %v1598_v26 = vpop.permute.xlu1 %1597  ;;  %v1605_v27 = vunpack.i.h.bf16 %v1603_v25  ;;  %v1604_v28 = vunpack.i.l.bf16 %v1603_v25 }
 0x1cd   :  { %v1600_v29 = vunpack.i.h.bf16 %v1598_v26  ;;  %v1599_v30 = vunpack.i.l.bf16 %v1598_v26 }
 0x1ce   :  { %v1505_v33 = vpack.c.bf16 %v1605_v27, %v1604_v28 }
 0x1cf   :  { %v1499_v31 = vpack.c.bf16 %v1600_v29, %v1599_v30 }
 0x1d0   :  { %v1608_v32 = vpop.permute.xlu1 %1607 }
 0x1d1   :  { %v1610_v34 = vunpack.i.h.bf16 %v1608_v32  ;;  %v1609_v35 = vunpack.i.l.bf16 %v1608_v32  ;;  %1501 = vmatprep.subr.msk.bf16.mxu1 %vm1789_vm2, %v1499_v31 }
 0x1d2   :  { %1504 = vmatpush3.bf16.xpose.msk.msra.mxu1 %vm1789_vm2, %v1499_v31 }
 0x1d3   :  { %1507 = vmatprep.subr.msk.bf16.mxu1 %vm1789_vm2, %v1505_v33  ;;  %v1511_v36 = vpack.c.bf16 %v1610_v34, %v1609_v35 }
 0x1d5   :  { %1513 = vmatprep.subr.msk.bf16.mxu0 %vm1789_vm2, %v1511_v36 }
 0x1d6   :  { %1516 = vmatpush3.bf16.xpose.msk.msra.mxu0 %vm1789_vm2, %v1511_v36 }
 0x1d9   :  { %1384 = vmatmul.mubr.msk.f32.vlgmr.msra.gmra.mrb[4].mxu1 %vm141_vm1, %v126_v15 }
 0x1da   :  { %1510 = vmatpush3.bf16.xpose.msk.msra.mxu1 %vm1789_vm2, %v1505_v33  ;;  %1390 = vmatprep.mubr.msk.f32.mxu1 %vm141_vm1, %v128_v13 }
 0x1dd   :  { %1398 = vmatmul.mubr.msk.f32.vlgmr.msra.gmra.mrb[0].mxu0 %vm141_vm1, %v134_v17 }
 0x1e1   :  { %1391 = vmatmul.mubr.msk.f32.vlgmr.msra.gmra.mrb[6].mxu1 %vm141_vm1, %v130_v11 }
 0x23f   :  { %v1378_v39 = vpop.f32.mrb[2].mxu1 }
 0x240   :  { %v222_v40 = vadd.f32 %v1378_v39, %v136_v37  ;;  %v216_v41 = vpop.f32.mrb[3].mxu1 }
 0x241   :  { %v217_v42 = vadd.f32 %v216_v41, %v135_v38 }
 0x242   :  { %v490_v43 = vsel %vm486_vm3, %v222_v40, -inf }
 0x243   :  { %491 = vmax.xlane.f32.xlu1 %v490_v43  ;;  %v487_v44 = vsel %vm486_vm3, %v217_v42, -inf }
 0x244   :  { %488 = vmax.xlane.f32.xlu0 %v487_v44 }
 0x2ac   :  { %v1385_v45 = vpop.f32.mrb[4].mxu1 }
 0x2ad   :  { %v309_v46 = vadd.f32 %v1385_v45, %v136_v37  ;;  %v303_v47 = vpop.f32.mrb[5].mxu1 }
 0x2ae   :  { %v304_v48 = vadd.f32 %v303_v47, %v135_v38 }
 0x2af   :  { %v496_v49 = vsel %vm486_vm3, %v309_v46, -inf }
 0x2b0   :  { %v1399_v50 = vpop.f32.mrb[0].mxu0  ;;  %497 = vmax.xlane.f32.xlu0 %v496_v49  ;;  %v493_v53 = vsel %vm486_vm3, %v304_v48, -inf }
 0x2b1   :  { %v477_v51 = vpop.f32.mrb[1].mxu0  ;;  %v483_v59 = vadd.f32 %v1399_v50, %v136_v37 }
 0x2b2   :  { %v478_v52 = vadd.f32 %v477_v51, %v135_v38 }
 0x2b3   :  { %v508_v62 = vsel %vm486_vm3, %v483_v59, -inf }
 0x2b4   :  { %v1392_v54 = vpop.f32.mrb[6].mxu1  ;;  %494 = vmax.xlane.f32.xlu0 %v493_v53  ;;  %v505_v55 = vsel %vm486_vm3, %v478_v52, -inf }
 0x2b5   :  { %v396_v56 = vadd.f32 %v1392_v54, %v136_v37  ;;  %506 = vmax.xlane.f32.xlu1 %v505_v55  ;;  %v390_v57 = vpop.f32.mrb[7].mxu1 }
 0x2b6   :  { %v1826_v58 = vadd.f32 %v390_v57, %v135_v38 }
 0x2b7   :  { %v502_v60 = vsel %vm486_vm3, %v396_v56, -inf }
 0x2b8   :  { %503 = vmax.xlane.f32.xlu0 %v502_v60  ;;  %v499_v61 = vsel %vm486_vm3, %v1826_v58, -inf }
 0x2b9   :  { %500 = vmax.xlane.f32.xlu1 %v499_v61 }
 0x2bc   :  { %509 = vmax.xlane.f32.xlu0 %v508_v62 }
 0x2ca   :  { %1612 = vrot.lane.b32.xlu1 %v1774_v10, %s1691_s8 }
 0x2d0   :  { %v492_v63 = vpop.xlane.xlu1 %491 }
 0x2d1   :  { %v512_v0 = vsub.f32 %v222_v40, %v492_v63  ;;  %v489_v2 = vpop.xlane.xlu0 %488 }
 0x2d2   :  { %v511_v3 = vsub.f32 %v217_v42, %v489_v2 }
 0x2d3   :  { %v521_v1 = vmul.f32 1.442695, %v512_v0 }
 0x2d4   :  { %v519_v4 = vmul.f32 1.442695, %v511_v3 }
 0x2d5   :  { %1631 = vpow2.f32 %v521_v1 }
 0x2d6   :  { %1633 = vpow2.f32 %v519_v4 }
 0x2df   :  { %v1632_v6 = vpop.eup %1631 }
 0x2e0   :  { %v538_v8 = vsel %vm486_vm3, %v1632_v6, 0.0  ;;  %v1634_v9 = vpop.eup %1633 }
 0x2e1   :  { %539 = vadd.xlane.f32.xlu0 %v538_v8  ;;  %v535_v11 = vsel %vm486_vm3, %v1634_v9, 0.0 }
 0x2ee   :  { %536 = vadd.xlane.f32.xlu1 %v535_v11 }
 0x33d   :  { %v498_v12 = vpop.xlane.xlu0 %497 }
 0x33e   :  { %v514_v13 = vsub.f32 %v309_v46, %v498_v12 }
 0x340   :  { %v525_v15 = vmul.f32 1.442695, %v514_v13 }
 0x341   :  { %v495_v10 = vpop.xlane.xlu0 %494 }
 0x342   :  { %1635 = vpow2.f32 %v525_v15  ;;  %v513_v17 = vsub.f32 %v304_v48, %v495_v10  ;;  %v507_v18 = vpop.xlane.xlu1 %506 }
 0x343   :  { %v517_v20 = vsub.f32 %v478_v52, %v507_v18 }
 0x344   :  { %v523_v21 = vmul.f32 1.442695, %v513_v17 }
 0x345   :  { %v531_v22 = vmul.f32 1.442695, %v517_v20  ;;  %v504_v23 = vpop.xlane.xlu0 %503 }
 0x346   :  { %1637 = vpow2.f32 %v523_v21  ;;  %v501_v24 = vpop.xlane.xlu1 %500  ;;  %v516_v25 = vsub.f32 %v396_v56, %v504_v23 }
 0x347   :  { %1639 = vpow2.f32 %v531_v22  ;;  %v515_v44 = vsub.f32 %v1826_v58, %v501_v24  ;;  %v954_v24 = vld [vmem:[%s1979_s2] sm:$0xff] }
 0x348   :  { %v529_v32 = vmul.f32 1.442695, %v516_v25  ;;  %v955_v25 = vld [vmem:[%s1979_s2 + $0x8] sm:$0xff] }
 0x349   :  { %v510_v26 = vpop.xlane.xlu0 %509  ;;  %v527_v46 = vmul.f32 1.442695, %v515_v44 }
 0x34a   :  { %v518_v27 = vsub.f32 %v483_v59, %v510_v26  ;;  %v1613_v28 = vpop.permute.xlu1 %1612  ;;  %v1533_v26 = vpack.c.bf16 %v955_v25, %v954_v24 }
 0x34b   :  { %v1615_v29 = vunpack.i.h.bf16 %v1613_v28  ;;  %v1614_v30 = vunpack.i.l.bf16 %v1613_v28 }
 0x34c   :  { %v1836_v31 = vpop.eup %1635  ;;  %v533_v33 = vmul.f32 1.442695, %v518_v27 }
 0x34d   :  { %v1517_v34 = vpack.c.bf16 %v1615_v29, %v1614_v30  ;;  %v544_v35 = vsel %vm486_vm3, %v1836_v31, 0.0  ;;  %v956_v29 = vld [vmem:[%s1979_s2 + $0x10] sm:$0xff]  ;;  %v957_v30 = vld [vmem:[%s1979_s2 + $0x18] sm:$0xff]  ;;  %s1694_s2 = smov 24  }
 0x34e   :  { %1641 = vpow2.f32 %v533_v33  ;;  %545 = vadd.xlane.f32.xlu0 %v544_v35  ;;  %v1049_v33 = vld [vmem:[%s1981_s4 + $0x8] sm:$0xff] }
 0x34f   :  { %1518 = vmatprep.subr.bf16.mxu1 %v1517_v34  ;;  %1643 = vpow2.f32 %v529_v32  ;;  %v1048_v32 = vld [vmem:[%s1981_s4] sm:$0xff] }
 0x350   :  { %v1638_v36 = vpop.eup %1637  ;;  %1520 = vmatpush3.bf16.msra.mxu1 %v1517_v34  ;;  %v1541_v34 = vpack.c.bf16 %v1049_v33, %v1048_v32 }
 0x351   :  { %v541_v37 = vsel %vm486_vm3, %v1638_v36, 0.0  ;;  %v1640_v38 = vpop.eup %1639 }
 0x352   :  { %542 = vadd.xlane.f32.xlu1 %v541_v37  ;;  %v553_v39 = vsel %vm486_vm3, %v1640_v38, 0.0 }
 0x356   :  { %554 = vadd.xlane.f32.xlu1 %v553_v39 }
 0x358   :  { %v1842_v40 = vpop.eup %1641 }
 0x359   :  { %v556_v41 = vsel %vm486_vm3, %v1842_v40, 0.0  ;;  %v1846_v42 = vpop.eup %1643 }
 0x35a   :  { %557 = vadd.xlane.f32.xlu0 %v556_v41  ;;  %v550_v43 = vsel %vm486_vm3, %v1846_v42, 0.0 }
 0x35e   :  { %551 = vadd.xlane.f32.xlu0 %v550_v43 }
 0x367   :  { %1622 = vrot.lane.b32.xlu1 %v1777_v14, %s1691_s8 }
 0x36e   :  { %v540_v45 = vpop.xlane.xlu0 %539 }
 0x36f   :  { %1645 = vrcp.f32 %v540_v45 }
 0x374   :  { %1617 = vrot.lane.b32.xlu0 %v1779_v16, %s1691_s8 }
 0x379   :  { %v1646_v48 = vpop.eup %1645 }
 0x37a   :  { %v568_v52 = vmul.f32 %v1646_v48, %v1632_v6 }
 0x37b   :  { %v537_v47 = vpop.xlane.xlu1 %536 }
 0x37c   :  { %1647 = vrcp.f32 %v537_v47 }
 0x37d   :  { %1649 = vpow2.f32 %v527_v46 }
 0x386   :  { %v1648_v49 = vpop.eup %1647 }
 0x387   :  { %v1650_v50 = vpop.eup %1649  ;;  %v567_v51 = vmul.f32 %v1648_v49, %v1634_v9 }
 0x388   :  { %v547_v14 = vsel %vm486_vm3, %v1650_v50, 0.0 }
 0x389   :  { %1404 = vmatprep.mubr.msk.f32.mxu1 %vm486_vm3, %v567_v51  ;;  %v1050_v51 = vld [vmem:[%s1981_s4 + $0x10] sm:$0xff] }
 0x38a   :  { %1405 = vmatmul.mubr.msk.f32.vlgmr.msra.gmra.mrb[8].mxu1 %vm486_vm3, %v568_v52  ;;  %v1051_v52 = vld [vmem:[%s1981_s4 + $0x18] sm:$0xff] }
 0x38b   :  { %548 = vadd.xlane.f32.xlu1 %v547_v14  ;;  %v1545_v14 = vpack.c.bf16 %v1051_v52, %v1050_v51 }
 0x39c   :  { %1627 = vrot.lane.b32.xlu1 %v1783_v19, %s1691_s8 }
 0x3db   :  { %v546_v53 = vpop.xlane.xlu0 %545 }
 0x3df   :  { %v543_v16 = vpop.xlane.xlu1 %542 }
 0x3e0   :  { %1651 = vrcp.f32 %v543_v16  ;;  %v1142_v16 = vld [vmem:[%s1983_s6] sm:$0xff] }
 0x3e1   :  { %1653 = vrcp.f32 %v546_v53  ;;  %v1143_v53 = vld [vmem:[%s1983_s6 + $0x8] sm:$0xff] }
 0x3e3   :  { %v555_v54 = vpop.xlane.xlu1 %554 }
 0x3e4   :  { %1655 = vrcp.f32 %v555_v54  ;;  %v1144_v54 = vld [vmem:[%s1983_s6 + $0x10] sm:$0xff] }
 0x3e7   :  { %v1623_v55 = vpop.permute.xlu1 %1622  ;;  %v558_v56 = vpop.xlane.xlu0 %557 }
 0x3e8   :  { %v1625_v57 = vunpack.i.h.bf16 %v1623_v55  ;;  %v1624_v58 = vunpack.i.l.bf16 %v1623_v55  ;;  %1657 = vrcp.f32 %v558_v56  ;;  %v1549_v55 = vpack.c.bf16 %v1143_v53, %v1142_v16  ;;  %v1145_v56 = vld [vmem:[%s1983_s6 + $0x18] sm:$0xff] }
 0x3ea   :  { %v1652_v59 = vpop.eup %1651  ;;  %v1525_v60 = vpack.c.bf16 %v1625_v57, %v1624_v58  ;;  %v1553_v57 = vpack.c.bf16 %v1145_v56, %v1144_v54  ;;  %v1146_v58 = vld [vmem:[%s1983_s6 + $0x20] sm:$0xff] }
 0x3eb   :  { %v552_v61 = vpop.xlane.xlu0 %551  ;;  %v569_v62 = vmul.f32 %v1652_v59, %v1638_v36  ;;  %v1654_v2 = vpop.eup %1653  ;;  %v1147_v59 = vld [vmem:[%s1983_s6 + $0x28] sm:$0xff] }
 0x3ec   :  { %1526 = vmatprep.subr.bf16.mxu0 %v1525_v60  ;;  %v570_v4 = vmul.f32 %v1654_v2, %v1836_v31  ;;  %1659 = vrcp.f32 %v552_v61  ;;  %v1537_v31 = vpack.c.bf16 %v957_v30, %v956_v29  ;;  %v1148_v61 = vld [vmem:[%s1983_s6 + $0x30] sm:$0xff] }
 0x3ed   :  { %1411 = vmatprep.mubr.msk.f32.mxu1 %vm486_vm3, %v569_v62  ;;  %1528 = vmatpush3.bf16.msra.mxu0 %v1525_v60  ;;  %v1557_v60 = vpack.c.bf16 %v1147_v59, %v1146_v58  ;;  %v1149_v62 = vld [vmem:[%s1983_s6 + $0x38] sm:$0xff]  ;;  %v1152_v2 = vld [vmem:[%s1983_s6 + $0x50] sm:$0xff] }
 0x3ee   :  { %v1656_v3 = vpop.eup %1655  ;;  %1534 = vmatprep.subr.bf16.mxu0 %v1533_v26 }
 0x3ef   :  { %v1618_v63 = vpop.permute.xlu0 %1617  ;;  %v573_v6 = vmul.f32 %v1656_v3, %v1640_v38  ;;  %v1153_v3 = vld [vmem:[%s1983_s6 + $0x58] sm:$0xff] }
 0x3f0   :  { %v1620_v19 = vunpack.i.h.bf16 %v1618_v63  ;;  %v1619_v0 = vunpack.i.l.bf16 %v1618_v63  ;;  %v1561_v63 = vpack.c.bf16 %v1149_v62, %v1148_v61 }
 0x3f2   :  { %v1521_v1 = vpack.c.bf16 %v1620_v19, %v1619_v0  ;;  %v1658_v15 = vpop.eup %1657  ;;  %v1150_v19 = vld [vmem:[%s1983_s6 + $0x40] sm:$0xff]  ;;  %v1151_v0 = vld [vmem:[%s1983_s6 + $0x48] sm:$0xff] }
 0x3f3   :  { %v574_v18 = vmul.f32 %v1658_v15, %v1842_v40 }
 0x3f4   :  { %1522 = vmatprep.subr.bf16.mxu1 %v1521_v1 }
 0x3f5   :  { %1524 = vmatpush3.bf16.msra.mxu1 %v1521_v1  ;;  %v1565_v1 = vpack.c.bf16 %v1151_v0, %v1150_v19 }
 0x3f6   :  { %v1660_v10 = vpop.eup %1659 }
 0x3f7   :  { %v572_v21 = vmul.f32 %v1660_v10, %v1846_v42 }
 0x3f8   :  { %1412 = vmatmul.mubr.msk.f32.vlgmr.msra.gmra.mrb[10].mxu1 %vm486_vm3, %v570_v4  ;;  %v1569_v4 = vpack.c.bf16 %v1153_v3, %v1152_v2 }
 0x3f9   :  { %1425 = vmatprep.mubr.msk.f32.mxu1 %vm486_vm3, %v573_v6  ;;  %v1154_v6 = vld [vmem:[%s1983_s6 + $0x60] sm:$0xff] }
 0x418   :  { %v549_v8 = vpop.xlane.xlu1 %548 }
 0x419   :  { %1661 = vrcp.f32 %v549_v8  ;;  %v1155_v8 = vld [vmem:[%s1983_s6 + $0x68] sm:$0xff] }
 0x41c   :  { %v1628_v9 = vpop.permute.xlu1 %1627 }
 0x41d   :  { %v1630_v11 = vunpack.i.h.bf16 %v1628_v9  ;;  %v1629_v12 = vunpack.i.l.bf16 %v1628_v9  ;;  %v1573_v9 = vpack.c.bf16 %v1155_v8, %v1154_v6 }
 0x41f   :  { %v1529_v13 = vpack.c.bf16 %v1630_v11, %v1629_v12  ;;  %v1286_v11 = vld [vmem:[%s1980_s3] ss:$0 sm:$0xff] }
 0x421   :  { %1530 = vmatprep.subr.bf16.mxu1 %v1529_v13 }
 0x422   :  { %1532 = vmatpush3.bf16.msra.mxu1 %v1529_v13 }
 0x423   :  { %v1662_v17 = vpop.eup %1661  ;;  %1542 = vmatprep.subr.bf16.mxu1 %v1541_v34 }
 0x424   :  { %v571_v20 = vmul.f32 %v1662_v17, %v1650_v50 }
 0x425   :  { %1426 = vmatmul.mubr.msk.f32.vlgmr.msra.gmra.mrb[12].mxu1 %vm486_vm3, %v574_v18 }
 0x426   :  { %1418 = vmatprep.mubr.msk.f32.mxu0 %vm486_vm3, %v571_v20  ;;  %1544 = vmatpush3.bf16.msra.mxu1 %v1541_v34  ;;  %v1156_v20 = vld [vmem:[%s1983_s6 + $0x70] sm:$0xff] }
 0x427   :  { %1419 = vmatmul.mubr.msk.f32.vlgmr.msra.gmra.mrb[2].mxu0 %vm486_vm3, %v572_v21  ;;  %1546 = vmatprep.subr.bf16.mxu1 %v1545_v14  ;;  %v1157_v21 = vld [vmem:[%s1983_s6 + $0x78] sm:$0xff]  ;;  %s1695_s6 = smov [#allocation2]  }
 0x428   :  { %1536 = vmatpush3.bf16.msra.mxu0 %v1533_v26  ;;  %s1249_s12 = sshll.u32 %s1695_s6, 4  ;;  %s1250_s12 = int_to_ptr.vmem [resolvable:$true] %s1249_s12 }
 0x429   :  { %1538 = vmatprep.subr.bf16.mxu0 %v1537_v31  ;;  %p1668_p1 = scmp.lt.s32.totalorder %s1250_s12, %s1250_s12 }
 0x42a   :  { %1548 = vmatpush3.bf16.msra.mxu1 %v1545_v14 }
 0x42c   :  { %1540 = vmatpush3.bf16.msra.mxu0 %v1537_v31 }
 0x42d   :  { %1550 = vmatprep.subr.bf16.mxu0 %v1549_v55 }
 0x45d   :  { %v1406_v22 = vpop.f32.mrb[8].mxu1 }
 0x45e   :  { %v653_v23 = vpop.f32.mrb[9].mxu1 }
 0x4cb   :  { %v1413_v27 = vpop.f32.mrb[10].mxu1 }
 0x4cc   :  { %927 = vrot.lane.b32.xlu1 %v1413_v27, %s1692_s10  ;;  %v740_v28 = vpop.f32.mrb[11].mxu1 }
 0x4cd   :  { %925 = vrot.lane.b32.xlu0 %v740_v28, %s1692_s10  ;;  %v1292_v28 = vld [vmem:[%s1984_s7] ss:$0 sm:$0xff] }
 0x4f8   :  { %v1427_v35 = vpop.f32.mrb[12].mxu1 }
 0x4f9   :  { %v914_v36 = vpop.f32.mrb[13].mxu1 }
 0x4fa   :  { %v1420_v37 = vpop.f32.mrb[2].mxu0 }
 0x4fb   :  { %v827_v38 = vpop.f32.mrb[3].mxu0  ;;  %935 = vrot.lane.b32.xlu1 %v1420_v37, %s1693_s19 }
 0x4fc   :  { %933 = vrot.lane.b32.xlu0 %v827_v38, %s1693_s19 }
 0x4ff   :  { %943 = vrot.lane.b32.xlu1 %v1427_v35, %s1694_s2 }
 0x500   :  { %941 = vrot.lane.b32.xlu0 %v914_v36, %s1694_s2 }
 0x53e   :  { %v928_v39 = vpop.permute.xlu1 %927 }
 0x53f   :  { %v926_v40 = vpop.permute.xlu0 %925  ;;  %v948_v45 = vsel %vm141_vm1, %v1406_v22, %v928_v39  ;;  %v1577_v22 = vpack.c.bf16 %v1157_v21, %v1156_v20 }
 0x540   :  { %v947_v43 = vsel %vm141_vm1, %v653_v23, %v926_v40 }
 0x56d   :  { %v936_v41 = vpop.permute.xlu1 %935 }
 0x56e   :  { %v934_v42 = vpop.permute.xlu0 %933  ;;  %v950_v48 = vsel %vm486_vm3, %v948_v45, %v936_v41 }
 0x56f   :  { %v949_v46 = vsel %vm486_vm3, %v947_v43, %v934_v42 }
 0x571   :  { %v944_v44 = vpop.permute.xlu1 %943 }
 0x572   :  { %v942_v47 = vpop.permute.xlu0 %941  ;;  %v953_v50 = vsel %vm951_vm4, %v950_v48, %v944_v44 }
 0x573   :  { %v952_v49 = vsel %vm951_vm4, %v949_v46, %v942_v47 }
 0x574   :  { %1436 = vmatprep.mubr.msk.f32.mxu0 %vm39_vm0, %v952_v49 }
 0x575   :  { %1437 = vmatmul.mubr.msk.f32.vlgmr.msra.gmra.mrb[4].mxu0 %vm39_vm0, %v953_v50 }
 0x576   :  { %1552 = vmatpush3.bf16.msra.mxu0 %v1549_v55 }
 0x577   :  { %1554 = vmatprep.subr.bf16.mxu0 %v1553_v57 }
 0x57a   :  { %1556 = vmatpush3.bf16.msra.mxu0 %v1553_v57 }
 0x57b   :  { %1558 = vmatprep.subr.bf16.mxu0 %v1557_v60 }
 0x57e   :  { %1560 = vmatpush3.bf16.msra.mxu0 %v1557_v60 }
 0x57f   :  { %1562 = vmatprep.subr.bf16.mxu0 %v1561_v63 }
 0x582   :  { %1564 = vmatpush3.bf16.msra.mxu0 %v1561_v63 }
 0x583   :  { %1566 = vmatprep.subr.bf16.mxu0 %v1565_v1 }
 0x586   :  { %1568 = vmatpush3.bf16.msra.mxu0 %v1565_v1 }
 0x587   :  { %1570 = vmatprep.subr.bf16.mxu0 %v1569_v4 }
 0x58a   :  { %1572 = vmatpush3.bf16.msra.mxu0 %v1569_v4 }
 0x58b   :  { %1574 = vmatprep.subr.bf16.mxu0 %v1573_v9 }
 0x58e   :  { %1576 = vmatpush3.bf16.msra.mxu0 %v1573_v9 }
 0x58f   :  { %1578 = vmatprep.subr.bf16.mxu0 %v1577_v22 }
 0x592   :  { %1580 = vmatpush3.bf16.msra.mxu0 %v1577_v22 }
 0x648   :  { %v1438_v12 = vpop.f32.mrb[4].mxu0 }
 0x649   :  { %v1043_v13 = vadd.f32 %v1438_v12, %v1286_v11  ;;  %v1037_v15 = vpop.f32.mrb[5].mxu0 }
 0x64a   :  { %v1038_v10 = vadd.f32 %v1286_v11, %v1037_v15 }
 0x64b   :  { %v1047_v18 = vadd.f32 %v1043_v13, %v1769_v7 }
 0x64c   :  { %v1046_v17 = vadd.f32 %v1038_v10, %v1762_v5  ;;  %v1289_v5 = vld [vmem:[%s1982_s5] ss:$0 sm:$0xff]  ;;  %s1663_s5 = scalar_lea.vmem %s1250_s12, 256 }
 0x64d   :  { %p1664_p0 = scmp.ne.s32.totalorder %s1250_s12, %s1663_s5  ;;  %p1669_p2 = scmp.lt.s32.totalorder %s1663_s5, %s1663_s5 }
 0x64e   :  { %1447 = vmatprep.mubr.msk.f32.mxu1 %vm39_vm0, %v1046_v17 }
 0x64f   :  { %1448 = vmatmul.mubr.msk.f32.vlgmr.msra.gmra.mrb[14].mxu1 %vm39_vm0, %v1047_v18  ;;  %p1670_p3 = por %p1669_p2, %p1668_p1 }
 0x651   :  { %p1671_p4 = pnand %p1670_p3, %p1664_p0 }
 0x722   :  { %v1449_v7 = vpop.f32.mrb[14].mxu1 }
 0x723   :  { %v1137_v23 = vadd.f32 %v1449_v7, %v1289_v5  ;;  %v1131_v24 = vpop.f32.mrb[15].mxu1 }
 0x724   :  { %v1132_v25 = vadd.f32 %v1289_v5, %v1131_v24 }
 0x725   :  { %v1141_v27 = vmax.f32 %v1137_v23, 0.0 }
 0x726   :  { %v1140_v26 = vmax.f32 %v1132_v25, 0.0 }
 0x728   :  { %1482 = vmatprep.mubr.f32.mxu0 %v1140_v26 }
 0x729   :  { %1483 = vmatmul.mubr.f32.vlgmr.msra.gmra.mrb[6].mxu0 %v1141_v27 }
 0x7fc   :  { %v1484_v29 = vpop.f32.mrb[6].mxu0 }
 0x7fd   :  { %v1237_v30 = vadd.f32 %v1484_v29, %v1292_v28  ;;  %v1231_v31 = vpop.f32.mrb[7].mxu0 }
 0x7fe   :  { %v1232_v32 = vadd.f32 %v1292_v28, %v1231_v31 }
 0x7ff   :  { %v1241_v33 = vadd.f32 %v1237_v30, %v1047_v18 }
 0x800   :  { %v1240_v34 = vadd.f32 %v1232_v32, %v1046_v17 }
 0x801   :  { %1243 = vst.msk [vmem:[#allocation2 + $0x8] sm:$0xff] %vm39_vm0, %v1241_v33 }
 0x802   :  { %1242 = vst.msk [vmem:[#allocation2] sm:$0xff] %vm39_vm0, %v1240_v34 }
 0x803   :  { %1674 = shalt.err (!%p1671_p4)
}
 0x804   :  { %s1675_s14 = scalar_lea.hbm %s1986_s9, 256 }
 0x805   :  { %p1676_p5 = scmp.ne.s32.totalorder %s1986_s9, %s1675_s14  ;;  %p1679_p6 = scmp.lt.u32.totalorder %s1675_s14, %s1986_s9 }
 0x807   :  { %p1681_p7 = pnand %p1679_p6, %p1676_p5 }
 0x809   :  { %1684 = shalt.err (!%p1681_p7)
}
 0x80a   :  { %s1696_s19 = smov 128  }
 0x80b   :  { %1255 = dma.vmem_to_hbm [thread:$0]  %s1250_s12, 256, %s1986_s9, [#allocation3], %s1696_s19, %s1696_s19, %s1692_s10  }
 0x80c   :  { %1685 = dma.done.wait [#allocation3], 256  }
 0x80d   :  { %1686 = vsyncadd [#allocation3], 4294967040 }
 0x80e   :  { %1259 = vsyncpa [#allocation3], 1 }

</bundles_post_ra>
